<compile_context>
chip_gen: v7x
topology: tpu7x:2x2x1
jax: 0.10.0
libtpu: 0.0.40
codegen_flags: <defaults>
</compile_context>

<pallas_src>
import functools

import jax
import jax.numpy as jnp
from jax.experimental import pallas as pl
from jax.experimental.pallas import tpu as pltpu


# ----------------------------------------------------------------------------
# Pallas kernel: fused 3x3 'same' conv for a block of images,
# channel-leading (lane-dense) layout, per-tap matmul accumulation.
# ----------------------------------------------------------------------------
def _bev_conv_kernel(x_ref, w_ref, b_ref, out_ref, *, nb, Cin, Cout, H, W):
    # x_ref   : (nb, Cin, H*W)   flattened NCHW input images (VMEM)
    # w_ref   : (9, Cout, Cin)   per-tap packed weights
    # b_ref   : (Cout, 1)        bias
    # out_ref : (nb, Cout, H*W)
    HW = H * W

    # ---- hoisted, computed once per grid step --------------------------------
    pos = jax.lax.broadcasted_iota(jnp.int32, (1, HW), 1)   # flat spatial index
    xx = pos % W                                            # column within a row

    # Per-tap validity masks for 'same' zero padding (None == no mask needed).
    masks = []
    offsets = []
    for dy in range(3):
        for dx in range(3):
            offsets.append((dy - 1) * W + (dx - 1))
            conds = []
            if dy == 0:
                conds.append(pos >= W)                # y - 1 >= 0
            if dy == 2:
                conds.append(pos < (H - 1) * W)       # y + 1 <= H - 1
            if dx == 0:
                conds.append(xx >= 1)                 # x - 1 >= 0
            if dx == 2:
                conds.append(xx <= W - 2)             # x + 1 <= W - 1
            masks.append(functools.reduce(jnp.logical_and, conds)
                         if conds else None)

    w_all = w_ref[...]                                # (9, Cout, Cin), one load
    bias = b_ref[...]                                 # (Cout, 1)

    # ---- per-image loop (nb is kept small; grid amortizes overhead) ----------
    for i in range(nb):
        x_img = x_ref[i]                              # (Cin, HW)
        acc = None                                    # (Cout, HW) f32 accumulator
        for t in range(9):
            off = offsets[t]
            if off == 0:
                shifted = x_img
            else:
                # shifted[:, m] == x_img[:, m + off]; wrap-around lanes are
                # exactly the out-of-bounds taps and get masked below.
                shifted = pltpu.roll(x_img, shift=(-off) % HW, axis=1)
            # Per-tap matmul: (Cout, Cin) @ (Cin, HW) -> (Cout, HW), f32 acc.
            part = jnp.dot(w_all[t], shifted, preferred_element_type=jnp.float32)
            if masks[t] is not None:
                # Mask the small (Cout, HW) partial (equivalent to masking the
                # shifted input: contraction is over channels only).
                part = jnp.where(masks[t], part, 0.0)
            acc = part if acc is None else acc + part
        out_ref[i] = (acc + bias).astype(out_ref.dtype)


# ----------------------------------------------------------------------------
# Wrapper: 3x3 stride-1 pad-1 conv == nn.Conv2d(k=3, padding=1), NCHW in/out.
# ----------------------------------------------------------------------------
def fused_conv3x3_same(x_nchw, weight_oihw, bias, *, images_per_block=None):
    N, Cin, H, W = x_nchw.shape
    Cout = weight_oihw.shape[0]
    HW = H * W
    itemsize = x_nchw.dtype.itemsize

    # Metadata-only reshape: (N, Cin, H, W) -> (N, Cin, H*W). No transposes.
    x_flat = x_nchw.reshape(N, Cin, HW)
    # Pack weights once: (Cout, Cin, 3, 3) -> (9, Cout, Cin), tap-major.
    w_packed = jnp.transpose(weight_oihw, (2, 3, 0, 1)).reshape(9, Cout, Cin)
    b_col = bias.reshape(Cout, 1)

    # --- images per grid step --------------------------------------------------
    # Goals: >= 4 grid steps when possible (>= 2 per v7x TensorCore so input
    # DMA double-buffers), double-buffered in+out blocks within a small VMEM
    # budget, and nb small enough that the static unroll stays cheap.
    if images_per_block is None:
        per_img = (Cin + Cout) * HW * itemsize          # one image in + out
        nb = max(1, N // 4)                             # >= 4 grid steps
        budget = 8 * 1024 * 1024                        # for double-buffered blocks
        nb = min(nb, max(1, budget // max(2 * per_img, 1)))
        nb = min(nb, 8)                                 # keep the unroll modest
        while N % nb != 0:                              # divisor of N
            nb -= 1
    else:
        nb = images_per_block
    assert N % nb == 0
    grid = (N // nb,)
    # TODO(synk): for production-size BEV maps (e.g. Cin=128, 200x200) add
    # spatial tiling over H with a 2-row halo so blocks fit v7x's 64 MiB VMEM.

    # --- explicit VMEM limit: count everything, with headroom -------------------
    in_block = nb * Cin * HW * itemsize
    out_block = nb * Cout * HW * itemsize
    w_bytes = 9 * Cout * Cin * 4 + Cout * 4
    vmem_needed = 2 * (in_block + out_block + w_bytes)   # double-buffered
    vmem_limit = int(min(max(vmem_needed + (4 << 20), 8 << 20), 32 << 20))

    kernel = functools.partial(_bev_conv_kernel,
                               nb=nb, Cin=Cin, Cout=Cout, H=H, W=W)

    out_flat = pl.pallas_call(
        kernel,
        out_shape=jax.ShapeDtypeStruct((N, Cout, HW), x_nchw.dtype),
        grid_spec=pltpu.PrefetchScalarGridSpec(
            num_scalar_prefetch=0,
            grid=grid,
            in_specs=[
                pl.BlockSpec((nb, Cin, HW), lambda g: (g, 0, 0)),
                pl.BlockSpec((9, Cout, Cin), lambda g: (0, 0, 0)),
                pl.BlockSpec((Cout, 1), lambda g: (0, 0)),
            ],
            out_specs=pl.BlockSpec((nb, Cout, HW), lambda g: (g, 0, 0)),
        ),
        compiler_params=pltpu.CompilerParams(
            dimension_semantics=("parallel",),
            vmem_limit_bytes=vmem_limit),
    )(x_flat, w_packed, b_col)

    return out_flat.reshape(N, Cout, H, W)


# ----------------------------------------------------------------------------
# BevSegHead (JAX / Pallas version)
# ----------------------------------------------------------------------------
class BevSegHead:
    def __init__(self, target, input_dim,
                 dynamic_output_class=None, static_output_class=None,
                 key=jax.random.PRNGKey(42)):
        self.target = target
        kd, ks = jax.random.split(key)
        if target in ('dynamic', 'both'):
            assert dynamic_output_class is not None
            self.dyn_w = 0.05 * jax.random.normal(
                kd, (dynamic_output_class, input_dim, 3, 3), jnp.float32)
            self.dyn_b = 0.01 * jnp.arange(dynamic_output_class, dtype=jnp.float32)
        if target in ('static', 'both'):
            assert static_output_class is not None
            self.stat_w = 0.05 * jax.random.normal(
                ks, (static_output_class, input_dim, 3, 3), jnp.float32)
            self.stat_b = 0.01 * jnp.arange(static_output_class, dtype=jnp.float32)

    def __call__(self, x, b, l):
        # x: (b*l, Cin, H, W)  -- NCHW, same as the PyTorch module.
        def rearr(m):  # '(b l) c h w -> b l c h w'
            _, c, h, w = m.shape
            return m.reshape(b, l, c, h, w)

        if self.target == 'dynamic':
            dynamic_map = rearr(fused_conv3x3_same(x, self.dyn_w, self.dyn_b))
            static_map = jnp.zeros_like(dynamic_map)
        elif self.target == 'static':
            static_map = rearr(fused_conv3x3_same(x, self.stat_w, self.stat_b))
            dynamic_map = jnp.zeros_like(static_map)
        else:
            # Fuse both heads into a single pallas_call (single pass over x),
            # split the channels afterwards (tiny slice).
            w_all = jnp.concatenate([self.dyn_w, self.stat_w], axis=0)
            b_all = jnp.concatenate([self.dyn_b, self.stat_b], axis=0)
            out_all = fused_conv3x3_same(x, w_all, b_all)
            dc = self.dyn_w.shape[0]
            dynamic_map = rearr(out_all[:, :dc])
            static_map = rearr(out_all[:, dc:])

        return {'static_seg': static_map, 'dynamic_seg': dynamic_map}


# ----------------------------------------------------------------------------
# Pure-JAX reference for verification
# ----------------------------------------------------------------------------
def _ref_conv3x3(x_nchw, weight_oihw, bias):
    out = jax.lax.conv_general_dilated(
        x_nchw, weight_oihw, window_strides=(1, 1), padding='SAME',
        dimension_numbers=('NCHW', 'OIHW', 'NCHW'))
    return out + bias.reshape(1, -1, 1, 1)


if __name__ == "__main__":
    b, l = 2, 2
    input_dim = 32
    dyn_cls, stat_cls = 2, 3
    H = W = 16

    key = jax.random.PRNGKey(0)
    x = jax.random.normal(key, (b * l, input_dim, H, W), jnp.float32)

    # 'both' target: fused dynamic+static heads in one kernel call.
    head = BevSegHead('both', input_dim,
                      dynamic_output_class=dyn_cls,
                      static_output_class=stat_cls)
    out = head(x, b, l)
    jax.block_until_ready(out)

    assert out['dynamic_seg'].shape == (b, l, dyn_cls, H, W)
    assert out['static_seg'].shape == (b, l, stat_cls, H, W)

    ref_dyn = _ref_conv3x3(x, head.dyn_w, head.dyn_b).reshape(b, l, dyn_cls, H, W)
    ref_stat = _ref_conv3x3(x, head.stat_w, head.stat_b).reshape(b, l, stat_cls, H, W)
    assert jnp.allclose(out['dynamic_seg'], ref_dyn, atol=2e-4, rtol=1e-4)
    assert jnp.allclose(out['static_seg'], ref_stat, atol=2e-4, rtol=1e-4)

    # 'dynamic'-only target: static map must be zeros of matching shape.
    head_dyn = BevSegHead('dynamic', input_dim, dynamic_output_class=dyn_cls)
    out_d = head_dyn(x, b, l)
    jax.block_until_ready(out_d)
    assert out_d['dynamic_seg'].shape == (b, l, dyn_cls, H, W)
    assert jnp.allclose(out_d['static_seg'], 0.0)
    ref_d = _ref_conv3x3(x, head_dyn.dyn_w, head_dyn.dyn_b).reshape(b, l, dyn_cls, H, W)
    assert jnp.allclose(out_d['dynamic_seg'], ref_d, atol=2e-4, rtol=1e-4)

    print("KERNEL_OK")
</pallas_src>

<mosaic_0001>
module attributes {stable_mosaic.version = 11 : i64} {
  func.func @_bev_conv_kernel(%arg0: i32, %arg1: memref<1x32x256xf32, #tpu.memory_space<vmem>>, %arg2: memref<9x5x32xf32, #tpu.memory_space<vmem>>, %arg3: memref<5x1xf32, #tpu.memory_space<vmem>>, %arg4: memref<1x5x256xf32, #tpu.memory_space<vmem>>) attributes {dimension_semantics = [#tpu.dimension_semantics<parallel>], iteration_bounds = array<i64: 4>, scalar_prefetch = 0 : i64, scratch_operands = 0 : i64, tpu.core_type = #tpu.core_type<tc>, window_params = [{transform_indices = @transform_0, window_bounds = array<i64: 1, 32, 256>}, {pipeline_mode = #tpu.pipeline_mode<synchronous>, transform_indices = @transform_1, window_bounds = array<i64: 9, 5, 32>}, {pipeline_mode = #tpu.pipeline_mode<synchronous>, transform_indices = @transform_2, window_bounds = array<i64: 5, 1>}, {transform_indices = @transform_3, window_bounds = array<i64: 1, 5, 256>}]} {
    %0 = tpu.iota {dimensions = array<i32: 1>} : vector<1x256xi32>
    %c16_i32 = arith.constant 16 : i32
    %c0_i32 = arith.constant 0 : i32
    %1 = arith.cmpi eq, %c16_i32, %c0_i32 : i32
    %c1_i32 = arith.constant 1 : i32
    %2 = arith.select %1, %c1_i32, %c16_i32 : i32
    %3 = vector.broadcast %2 : i32 to vector<1x256xi32>
    %4 = arith.remsi %0, %3 : vector<1x256xi32>
    %c0_i32_0 = arith.constant 0 : i32
    %5 = vector.broadcast %c0_i32_0 : i32 to vector<1x256xi32>
    %6 = arith.cmpi ne, %4, %5 : vector<1x256xi32>
    %c0_i32_1 = arith.constant 0 : i32
    %7 = vector.broadcast %c0_i32_1 : i32 to vector<1x256xi32>
    %8 = arith.cmpi slt, %4, %7 : vector<1x256xi32>
    %c0_i32_2 = arith.constant 0 : i32
    %9 = arith.cmpi slt, %2, %c0_i32_2 : i32
    %10 = vector.broadcast %9 : i1 to vector<1x256xi1>
    %11 = vector.broadcast %10 : vector<1x256xi1> to vector<1x256xi1>
    %12 = arith.xori %8, %11 : vector<1x256xi1>
    %13 = arith.andi %12, %6 : vector<1x256xi1>
    %14 = vector.broadcast %2 : i32 to vector<1x256xi32>
    %15 = arith.addi %4, %14 : vector<1x256xi32>
    %16 = arith.select %13, %15, %4 : vector<1x256xi1>, vector<1x256xi32>
    %c16_i32_3 = arith.constant 16 : i32
    %17 = vector.broadcast %c16_i32_3 : i32 to vector<1x256xi32>
    %18 = arith.cmpi sge, %0, %17 : vector<1x256xi32>
    %c1_i32_4 = arith.constant 1 : i32
    %19 = vector.broadcast %c1_i32_4 : i32 to vector<1x256xi32>
    %20 = arith.cmpi sge, %16, %19 : vector<1x256xi32>
    %21 = arith.andi %18, %20 : vector<1x256xi1>
    %c16_i32_5 = arith.constant 16 : i32
    %22 = vector.broadcast %c16_i32_5 : i32 to vector<1x256xi32>
    %23 = arith.cmpi sge, %0, %22 : vector<1x256xi32>
    %c16_i32_6 = arith.constant 16 : i32
    %24 = vector.broadcast %c16_i32_6 : i32 to vector<1x256xi32>
    %25 = arith.cmpi sge, %0, %24 : vector<1x256xi32>
    %c14_i32 = arith.constant 14 : i32
    %26 = vector.broadcast %c14_i32 : i32 to vector<1x256xi32>
    %27 = arith.cmpi sle, %16, %26 : vector<1x256xi32>
    %28 = arith.andi %25, %27 : vector<1x256xi1>
    %c1_i32_7 = arith.constant 1 : i32
    %29 = vector.broadcast %c1_i32_7 : i32 to vector<1x256xi32>
    %30 = arith.cmpi sge, %16, %29 : vector<1x256xi32>
    %c14_i32_8 = arith.constant 14 : i32
    %31 = vector.broadcast %c14_i32_8 : i32 to vector<1x256xi32>
    %32 = arith.cmpi sle, %16, %31 : vector<1x256xi32>
    %c240_i32 = arith.constant 240 : i32
    %33 = vector.broadcast %c240_i32 : i32 to vector<1x256xi32>
    %34 = arith.cmpi slt, %0, %33 : vector<1x256xi32>
    %c1_i32_9 = arith.constant 1 : i32
    %35 = vector.broadcast %c1_i32_9 : i32 to vector<1x256xi32>
    %36 = arith.cmpi sge, %16, %35 : vector<1x256xi32>
    %37 = arith.andi %34, %36 : vector<1x256xi1>
    %c240_i32_10 = arith.constant 240 : i32
    %38 = vector.broadcast %c240_i32_10 : i32 to vector<1x256xi32>
    %39 = arith.cmpi slt, %0, %38 : vector<1x256xi32>
    %c240_i32_11 = arith.constant 240 : i32
    %40 = vector.broadcast %c240_i32_11 : i32 to vector<1x256xi32>
    %41 = arith.cmpi slt, %0, %40 : vector<1x256xi32>
    %c14_i32_12 = arith.constant 14 : i32
    %42 = vector.broadcast %c14_i32_12 : i32 to vector<1x256xi32>
    %43 = arith.cmpi sle, %16, %42 : vector<1x256xi32>
    %44 = arith.andi %41, %43 : vector<1x256xi1>
    %c0 = arith.constant 0 : index
    %c0_13 = arith.constant 0 : index
    %c0_14 = arith.constant 0 : index
    %45 = vector.load %arg2[%c0, %c0_13, %c0_14] : memref<9x5x32xf32, #tpu.memory_space<vmem>>, vector<9x5x32xf32>
    %c0_15 = arith.constant 0 : index
    %c0_16 = arith.constant 0 : index
    %46 = vector.load %arg3[%c0_15, %c0_16] : memref<5x1xf32, #tpu.memory_space<vmem>>, vector<5x1xf32>
    %c0_17 = arith.constant 0 : index
    %c0_18 = arith.constant 0 : index
    %c0_19 = arith.constant 0 : index
    %47 = vector.load %arg1[%c0_17, %c0_18, %c0_19] : memref<1x32x256xf32, #tpu.memory_space<vmem>>, vector<1x32x256xf32>
    %48 = vector.shape_cast %47 : vector<1x32x256xf32> to vector<32x256xf32>
    %c17_i32 = arith.constant 17 : i32
    %49 = tpu.dynamic_rotate %48 by %c17_i32 dim 1 : vector<32x256xf32>, i32 -> vector<32x256xf32>
    %50 = vector.extract_strided_slice %45 {offsets = [0, 0, 0], sizes = [1, 5, 32], strides = [1, 1, 1]} : vector<9x5x32xf32> to vector<1x5x32xf32>
    %51 = vector.shape_cast %50 : vector<1x5x32xf32> to vector<5x32xf32>
    %cst = arith.constant dense<0.000000e+00> : vector<5x256xf32>
    %52 = tpu.matmul %51, %49, %cst {dimension_numbers = #tpu.dot_dimension_numbers<[1], [0], [0], [1], [0, 0, 1, 1], [], []>} : vector<5x32xf32>, vector<32x256xf32>, vector<5x256xf32> -> vector<5x256xf32>
    %cst_20 = arith.constant 0.000000e+00 : f32
    %53 = vector.shape_cast %21 : vector<1x256xi1> to vector<1x256xi1>
    %54 = vector.broadcast %53 : vector<1x256xi1> to vector<5x256xi1>
    %55 = vector.broadcast %cst_20 : f32 to vector<5x256xf32>
    %56 = arith.select %54, %52, %55 : vector<5x256xi1>, vector<5x256xf32>
    %c16_i32_21 = arith.constant 16 : i32
    %57 = tpu.dynamic_rotate %48 by %c16_i32_21 dim 1 : vector<32x256xf32>, i32 -> vector<32x256xf32>
    %58 = vector.extract_strided_slice %45 {offsets = [1, 0, 0], sizes = [1, 5, 32], strides = [1, 1, 1]} : vector<9x5x32xf32> to vector<1x5x32xf32>
    %59 = vector.shape_cast %58 : vector<1x5x32xf32> to vector<5x32xf32>
    %cst_22 = arith.constant dense<0.000000e+00> : vector<5x256xf32>
    %60 = tpu.matmul %59, %57, %cst_22 {dimension_numbers = #tpu.dot_dimension_numbers<[1], [0], [0], [1], [0, 0, 1, 1], [], []>} : vector<5x32xf32>, vector<32x256xf32>, vector<5x256xf32> -> vector<5x256xf32>
    %cst_23 = arith.constant 0.000000e+00 : f32
    %61 = vector.shape_cast %23 : vector<1x256xi1> to vector<1x256xi1>
    %62 = vector.broadcast %61 : vector<1x256xi1> to vector<5x256xi1>
    %63 = vector.broadcast %cst_23 : f32 to vector<5x256xf32>
    %64 = arith.select %62, %60, %63 : vector<5x256xi1>, vector<5x256xf32>
    %65 = arith.addf %56, %64 : vector<5x256xf32>
    %c15_i32 = arith.constant 15 : i32
    %66 = tpu.dynamic_rotate %48 by %c15_i32 dim 1 : vector<32x256xf32>, i32 -> vector<32x256xf32>
    %67 = vector.extract_strided_slice %45 {offsets = [2, 0, 0], sizes = [1, 5, 32], strides = [1, 1, 1]} : vector<9x5x32xf32> to vector<1x5x32xf32>
    %68 = vector.shape_cast %67 : vector<1x5x32xf32> to vector<5x32xf32>
    %cst_24 = arith.constant dense<0.000000e+00> : vector<5x256xf32>
    %69 = tpu.matmul %68, %66, %cst_24 {dimension_numbers = #tpu.dot_dimension_numbers<[1], [0], [0], [1], [0, 0, 1, 1], [], []>} : vector<5x32xf32>, vector<32x256xf32>, vector<5x256xf32> -> vector<5x256xf32>
    %cst_25 = arith.constant 0.000000e+00 : f32
    %70 = vector.shape_cast %28 : vector<1x256xi1> to vector<1x256xi1>
    %71 = vector.broadcast %70 : vector<1x256xi1> to vector<5x256xi1>
    %72 = vector.broadcast %cst_25 : f32 to vector<5x256xf32>
    %73 = arith.select %71, %69, %72 : vector<5x256xi1>, vector<5x256xf32>
    %74 = arith.addf %65, %73 : vector<5x256xf32>
    %c1_i32_26 = arith.constant 1 : i32
    %75 = tpu.dynamic_rotate %48 by %c1_i32_26 dim 1 : vector<32x256xf32>, i32 -> vector<32x256xf32>
    %76 = vector.extract_strided_slice %45 {offsets = [3, 0, 0], sizes = [1, 5, 32], strides = [1, 1, 1]} : vector<9x5x32xf32> to vector<1x5x32xf32>
    %77 = vector.shape_cast %76 : vector<1x5x32xf32> to vector<5x32xf32>
    %cst_27 = arith.constant dense<0.000000e+00> : vector<5x256xf32>
    %78 = tpu.matmul %77, %75, %cst_27 {dimension_numbers = #tpu.dot_dimension_numbers<[1], [0], [0], [1], [0, 0, 1, 1], [], []>} : vector<5x32xf32>, vector<32x256xf32>, vector<5x256xf32> -> vector<5x256xf32>
    %cst_28 = arith.constant 0.000000e+00 : f32
    %79 = vector.shape_cast %30 : vector<1x256xi1> to vector<1x256xi1>
    %80 = vector.broadcast %79 : vector<1x256xi1> to vector<5x256xi1>
    %81 = vector.broadcast %cst_28 : f32 to vector<5x256xf32>
    %82 = arith.select %80, %78, %81 : vector<5x256xi1>, vector<5x256xf32>
    %83 = arith.addf %74, %82 : vector<5x256xf32>
    %84 = vector.extract_strided_slice %45 {offsets = [4, 0, 0], sizes = [1, 5, 32], strides = [1, 1, 1]} : vector<9x5x32xf32> to vector<1x5x32xf32>
    %85 = vector.shape_cast %84 : vector<1x5x32xf32> to vector<5x32xf32>
    %cst_29 = arith.constant dense<0.000000e+00> : vector<5x256xf32>
    %86 = tpu.matmul %85, %48, %cst_29 {dimension_numbers = #tpu.dot_dimension_numbers<[1], [0], [0], [1], [0, 0, 1, 1], [], []>} : vector<5x32xf32>, vector<32x256xf32>, vector<5x256xf32> -> vector<5x256xf32>
    %87 = arith.addf %83, %86 : vector<5x256xf32>
    %c255_i32 = arith.constant 255 : i32
    %88 = tpu.dynamic_rotate %48 by %c255_i32 dim 1 : vector<32x256xf32>, i32 -> vector<32x256xf32>
    %89 = vector.extract_strided_slice %45 {offsets = [5, 0, 0], sizes = [1, 5, 32], strides = [1, 1, 1]} : vector<9x5x32xf32> to vector<1x5x32xf32>
    %90 = vector.shape_cast %89 : vector<1x5x32xf32> to vector<5x32xf32>
    %cst_30 = arith.constant dense<0.000000e+00> : vector<5x256xf32>
    %91 = tpu.matmul %90, %88, %cst_30 {dimension_numbers = #tpu.dot_dimension_numbers<[1], [0], [0], [1], [0, 0, 1, 1], [], []>} : vector<5x32xf32>, vector<32x256xf32>, vector<5x256xf32> -> vector<5x256xf32>
    %cst_31 = arith.constant 0.000000e+00 : f32
    %92 = vector.shape_cast %32 : vector<1x256xi1> to vector<1x256xi1>
    %93 = vector.broadcast %92 : vector<1x256xi1> to vector<5x256xi1>
    %94 = vector.broadcast %cst_31 : f32 to vector<5x256xf32>
    %95 = arith.select %93, %91, %94 : vector<5x256xi1>, vector<5x256xf32>
    %96 = arith.addf %87, %95 : vector<5x256xf32>
    %c241_i32 = arith.constant 241 : i32
    %97 = tpu.dynamic_rotate %48 by %c241_i32 dim 1 : vector<32x256xf32>, i32 -> vector<32x256xf32>
    %98 = vector.extract_strided_slice %45 {offsets = [6, 0, 0], sizes = [1, 5, 32], strides = [1, 1, 1]} : vector<9x5x32xf32> to vector<1x5x32xf32>
    %99 = vector.shape_cast %98 : vector<1x5x32xf32> to vector<5x32xf32>
    %cst_32 = arith.constant dense<0.000000e+00> : vector<5x256xf32>
    %100 = tpu.matmul %99, %97, %cst_32 {dimension_numbers = #tpu.dot_dimension_numbers<[1], [0], [0], [1], [0, 0, 1, 1], [], []>} : vector<5x32xf32>, vector<32x256xf32>, vector<5x256xf32> -> vector<5x256xf32>
    %cst_33 = arith.constant 0.000000e+00 : f32
    %101 = vector.shape_cast %37 : vector<1x256xi1> to vector<1x256xi1>
    %102 = vector.broadcast %101 : vector<1x256xi1> to vector<5x256xi1>
    %103 = vector.broadcast %cst_33 : f32 to vector<5x256xf32>
    %104 = arith.select %102, %100, %103 : vector<5x256xi1>, vector<5x256xf32>
    %105 = arith.addf %96, %104 : vector<5x256xf32>
    %c240_i32_34 = arith.constant 240 : i32
    %106 = tpu.dynamic_rotate %48 by %c240_i32_34 dim 1 : vector<32x256xf32>, i32 -> vector<32x256xf32>
    %107 = vector.extract_strided_slice %45 {offsets = [7, 0, 0], sizes = [1, 5, 32], strides = [1, 1, 1]} : vector<9x5x32xf32> to vector<1x5x32xf32>
    %108 = vector.shape_cast %107 : vector<1x5x32xf32> to vector<5x32xf32>
    %cst_35 = arith.constant dense<0.000000e+00> : vector<5x256xf32>
    %109 = tpu.matmul %108, %106, %cst_35 {dimension_numbers = #tpu.dot_dimension_numbers<[1], [0], [0], [1], [0, 0, 1, 1], [], []>} : vector<5x32xf32>, vector<32x256xf32>, vector<5x256xf32> -> vector<5x256xf32>
    %cst_36 = arith.constant 0.000000e+00 : f32
    %110 = vector.shape_cast %39 : vector<1x256xi1> to vector<1x256xi1>
    %111 = vector.broadcast %110 : vector<1x256xi1> to vector<5x256xi1>
    %112 = vector.broadcast %cst_36 : f32 to vector<5x256xf32>
    %113 = arith.select %111, %109, %112 : vector<5x256xi1>, vector<5x256xf32>
    %114 = arith.addf %105, %113 : vector<5x256xf32>
    %c239_i32 = arith.constant 239 : i32
    %115 = tpu.dynamic_rotate %48 by %c239_i32 dim 1 : vector<32x256xf32>, i32 -> vector<32x256xf32>
    %116 = vector.extract_strided_slice %45 {offsets = [8, 0, 0], sizes = [1, 5, 32], strides = [1, 1, 1]} : vector<9x5x32xf32> to vector<1x5x32xf32>
    %117 = vector.shape_cast %116 : vector<1x5x32xf32> to vector<5x32xf32>
    %cst_37 = arith.constant dense<0.000000e+00> : vector<5x256xf32>
    %118 = tpu.matmul %117, %115, %cst_37 {dimension_numbers = #tpu.dot_dimension_numbers<[1], [0], [0], [1], [0, 0, 1, 1], [], []>} : vector<5x32xf32>, vector<32x256xf32>, vector<5x256xf32> -> vector<5x256xf32>
    %cst_38 = arith.constant 0.000000e+00 : f32
    %119 = vector.shape_cast %44 : vector<1x256xi1> to vector<1x256xi1>
    %120 = vector.broadcast %119 : vector<1x256xi1> to vector<5x256xi1>
    %121 = vector.broadcast %cst_38 : f32 to vector<5x256xf32>
    %122 = arith.select %120, %118, %121 : vector<5x256xi1>, vector<5x256xf32>
    %123 = arith.addf %114, %122 : vector<5x256xf32>
    %124 = vector.broadcast %46 : vector<5x1xf32> to vector<5x256xf32>
    %125 = arith.addf %123, %124 : vector<5x256xf32>
    %c0_39 = arith.constant 0 : index
    %c0_40 = arith.constant 0 : index
    %c0_41 = arith.constant 0 : index
    %126 = vector.load %arg4[%c0_39, %c0_40, %c0_41] : memref<1x5x256xf32, #tpu.memory_space<vmem>>, vector<1x5x256xf32>
    %127 = vector.shape_cast %126 : vector<1x5x256xf32> to vector<5x256xf32>
    %128 = vector.shape_cast %125 : vector<5x256xf32> to vector<1x5x256xf32>
    tpu.vector_store %arg4[%c0_39, %c0_40, %c0_41], %128 {strides = array<i32>} : memref<1x5x256xf32, #tpu.memory_space<vmem>>, vector<1x5x256xf32>,
    return
  }
  func.func @transform_0(%arg0: i32) -> (i32, i32, i32) {
    %c0_i32 = arith.constant 0 : i32
    %c0_i32_0 = arith.constant 0 : i32
    %c0_i32_1 = arith.constant 0 : i32
    return %arg0, %c0_i32, %c0_i32_0 : i32, i32, i32
  }
  func.func @transform_1(%arg0: i32) -> (i32, i32, i32) {
    %c0_i32 = arith.constant 0 : i32
    %c0_i32_0 = arith.constant 0 : i32
    %c0_i32_1 = arith.constant 0 : i32
    %c0_i32_2 = arith.constant 0 : i32
    return %c0_i32, %c0_i32_0, %c0_i32_1 : i32, i32, i32
  }
  func.func @transform_2(%arg0: i32) -> (i32, i32) {
    %c0_i32 = arith.constant 0 : i32
    %c0_i32_0 = arith.constant 0 : i32
    %c0_i32_1 = arith.constant 0 : i32
    return %c0_i32, %c0_i32_0 : i32, i32
  }
  func.func @transform_3(%arg0: i32) -> (i32, i32, i32) {
    %c0_i32 = arith.constant 0 : i32
    %c0_i32_0 = arith.constant 0 : i32
    %c0_i32_1 = arith.constant 0 : i32
    return %arg0, %c0_i32, %c0_i32_0 : i32, i32, i32
  }
}

</mosaic_0001>

<bundles_post_ra>
// kernel: tpu_custom_call.1
= control target key start
LH: loop header
LB: loop body
LE: loop exit
PB: predicated region body
PF: predicated region fallthrough
CT: control target
= control target key end

     0   :  { %8 = vsyncpa [#allocation3], 0  ;;  %s2131_s0 = inlined_call_operand.hbm [shape: f32[4,32,256], index: 0, kind: input, shape index: {}]   ;;  %s2132_s1 = inlined_call_operand.hbm [shape: f32[9,5,32], index: 1, kind: input, shape index: {}]   ;;  %s2133_s2 = inlined_call_operand.vmem [shape: f32[5,1], index: 2, kind: input, shape index: {}]   ;;  %s2134_s3 = inlined_call_operand.vmem [shape: f32[4,5,256], index: 3, kind: output, shape index: {}]  }
   0x1   :  { %10 = vsyncpa [#allocation3 + $0x1], 0 }
   0x2   :  { %11 = vsyncpa [#allocation5], 0  ;;  %s1740_s12 = smov 0   ;;  %s1742_s13 = smov 0  }
   0x3   :  { %s1744_s14 = smov 0   ;;  %s1746_s15 = smov 0  }
   0x4 LB: > { %s1759_s16 = sadd.s32 4294967295, %s1702_s15   ;;  %p37_p0 = scmp.ne.s32.totalorder %s1694_s13, %s1690_s12  ;;  %s1702_s15 = sphi %s1746_s15, %s2157_s15   ;;  %s1698_s14 = sphi %s1744_s14, %s2156_s14   ;;  %s1694_s13 = sphi %s1742_s13, %s2155_s13   ;;  %s1690_s12 = sphi %s1740_s12, %s2154_s12  }
   0x5   : > { %p2135_p1 = scmp.eq.s32.totalorder %s1759_s16, 0  ;;  %p1285_p2 = scmp.ge.s32.totalorder %s1702_s15, 1 }
   0x6   : > { %p116_p3 = scmp.lt.s32.totalorder %s1702_s15, 5  ;;  %s1704_s19 = smov [#allocation4]  }
   0x7   : > { %p1767_p4 = por %p2135_p1, %p37_p0  ;;  %s128_s20 = sshll.u32 %s1704_s19, 4  ;;  %s129_s20 = int_to_ptr.vmem [resolvable:$true] %s128_s20 }
   0x8   : > { %p1771_p5 = pnand %p1285_p2, %p116_p3  ;;  %s1784_s22 = sadd.s32 1, %s1702_s15  }
   0x9   : > { %s2138_s17 = scalar_select %p1767_p4, 1, 0 }
   0xa   : > { %s2139_s18 = scalar_select %p1771_p5, 1, 0 }
   0xb   : > { %p1387_p6 = pneg %p1771_p5  ;;  %s24_s23 = sadd.s32 1, %s1698_s14 }
   0xc   : > { %s21_s24 = ssub.s32 %s1702_s15, %s1784_s22  ;;  %s1606_s27 = scalar_lea.hbm %s2132_s1, 1152 }
   0xd   : > { %p1779_p7 = pnand %p1387_p6, %p2135_p1  ;;  %p1607_p8 = scmp.ne.s32.totalorder %s2132_s1, %s1606_s27 }
   0xe   : > { %p1613_p12 = scmp.lt.u32.totalorder %s1606_s27, %s2132_s1 }
   0xf   : > { %p1608_p9 = pneg %p1779_p7 }
  0x11   : > { %p1609_p10 = pnand %p1608_p9, %p1607_p8 }
  0x13   : > { %p1610_p11 = pneg %p1609_p10 }
  0x15   : > { %p1615_p13 = pnand %p1613_p12, %p1610_p11 }
  0x17   : > { %1618 = shalt.err (!%p1615_p13)
}
  0x18   : > { %s1619_s5 = scalar_lea.vmem %s129_s20, 1152  ;;  %p1627_p6 = scmp.lt.s32.totalorder %s129_s20, %s129_s20 }
  0x19   : > { %p1620_p0 = scmp.ne.s32.totalorder %s129_s20, %s1619_s5  ;;  %p1628_p1 = scmp.lt.s32.totalorder %s1619_s5, %s1619_s5 }
  0x1b   : > { %p1622_p2 = pnand %p1620_p0, %p1608_p9  ;;  %p1629_p4 = por %p1628_p1, %p1627_p6 }
  0x1d   : > { %p1623_p3 = pneg %p1622_p2 }
  0x1f   : > { %p1630_p5 = pnand %p1629_p4, %p1623_p3 }
  0x21   : > { %1633 = shalt.err (!%p1630_p5)
}
  0x22   : > { %s1705_s6 = smov 128   ;;  %s1706_s7 = smov 8  }
  0x23   : > { %1390 = dma.hbm_to_vmem [thread:$0]  (!%p1779_p7), %s2132_s1, 1152, %s129_s20, [#allocation5], %s1705_s6, %s1705_s6, %s1706_s7  }
  0x24   : > { %p22_p8 = scmp.eq.s32.totalorder %s21_s24, 0  ;;  %p31_p9 = scmp.ne.s32.totalorder %s1698_s14, %s1694_s13 }
  0x25   : > { %p32_p1 = scmp.eq.s32.totalorder %s1702_s15, 0  ;;  %p1396_p4 = scmp.lt.s32.totalorder %s1702_s15, 4 }
  0x26   : > { %s1810_s10 = scalar_select %p22_p8, %s1698_s14, %s24_s23  }
  0x27   : > { %p33_p5 = por %p32_p1, %p31_p9  ;;  %s145_s11 = sand.u32 1, %s1698_s14  }
  0x28   : > { %s1288_s12 = sshll.u32 %s145_s11, 6  ;;  %s1307_s19 = sshll.u32 %s1702_s15, 10 }
  0x29   : > { %s1817_s27 = scalar_lea.hbm %s2131_s0, %s1307_s19  ;;  %s149_s20 = scalar_lea.vmem [#allocation2], %s1288_s12 }
  0x2a   : > { %s156_s21 = sshll.u32 %s149_s20, 4  ;;  %p1821_p7 = pnand %p1396_p4, %p33_p5  ;;  %s1819_s21 = int_to_ptr.vmem [resolvable:$true] %s156_s21 }
  0x2b   : > { %s1825_s15 = scalar_lea.sflag [#allocation3], %s145_s11  ;;  %s1634_s24 = scalar_lea.hbm %s1817_s27, 1024 }
  0x2c   : > { %p1635_p10 = scmp.ne.s32.totalorder %s1817_s27, %s1634_s24  ;;  %p1636_p11 = pneg %p1821_p7 }
  0x2d   : > { %s1639_s30 = scalar_lea.hbm %s2131_s0, 4096  ;;  %p1640_p0 = scmp.lt.u32.totalorder %s1817_s27, %s2131_s0 }
  0x2e   : > { %p1637_p12 = pnand %p1636_p11, %p1635_p10  ;;  %p1641_p2 = scmp.lt.u32.totalorder %s1639_s30, %s1634_s24 }
  0x2f   : > { %p1643_p6 = scmp.lt.u32.totalorder %s1634_s24, %s1817_s27 }
  0x30   : > { %p1638_p13 = pneg %p1637_p12  ;;  %p1642_p3 = por %p1641_p2, %p1640_p0 }
  0x32   : > { %p1644_p8 = por %p1643_p6, %p1642_p3 }
  0x34   : > { %p1645_p9 = pnand %p1644_p8, %p1638_p13 }
  0x36   : > { %1648 = shalt.err (!%p1645_p9)
}
  0x37   : > { %s1649_s6 = scalar_lea.vmem %s1819_s21, 1024  ;;  %s1707_s7 = smov [#allocation2]  }
  0x38   : > { %p1650_p1 = scmp.ne.s32.totalorder %s1819_s21, %s1649_s6  ;;  %s1654_s8 = sshll.u32 %s1707_s7, 4  ;;  %s1655_s8 = int_to_ptr.vmem [resolvable:$false] %s1654_s8 }
  0x39   : > { %s1656_s9 = scalar_lea.vmem %s1655_s8, 2048  ;;  %p1657_p10 = scmp.lt.s32.totalorder %s1819_s21, %s1655_s8 }
  0x3a   : > { %p1652_p4 = pnand %p1650_p1, %p1636_p11  ;;  %p1658_p12 = scmp.lt.s32.totalorder %s1656_s9, %s1649_s6 }
  0x3c   : > { %p1653_p5 = pneg %p1652_p4  ;;  %p1659_p0 = por %p1658_p12, %p1657_p10 }
  0x3e   : > { %p1660_p2 = pnand %p1659_p0, %p1653_p5 }
  0x40   : > { %1663 = shalt.err (!%p1660_p2)
}
  0x41   : > { %s1708_s11 = smov 256   ;;  %s1709_s12 = smov 16  }
  0x42   : > { %1394 = dma.hbm_to_vmem [thread:$0]  (!%p1821_p7), %s1817_s27, 1024, %s1819_s21, %s1825_s15, %s1708_s11, %s1708_s11, %s1709_s12  }
  0x43   : > { %p2142_p11 = scmp.ne.s32.totalorder %s2139_s18, 0 }
  0x44   : > { %s170_s19 = sand.u32 (!%p2142_p11), 1, %s1694_s13   ;;  %p2143_p13 = scmp.ne.s32.totalorder (!%p2142_p11), %s2138_s17, 0 }
  0x45   : > { %168 = sbr.rel (%p2142_p11) target bundleno = 487 (0x1e7), region = 32  ;;  %s1292_s25 = sshll.u32 (!%p2142_p11), %s170_s19, 6 }
  0x46   : > { %s171_s26 = scalar_lea.sflag (!%p2142_p11), [#allocation3], %s170_s19  ;;  %s174_s20 = scalar_lea.vmem (!%p2142_p11), [#allocation2], %s1292_s25 }
  0x4c   : > { %1681 = dma.done.wait (%p2143_p13), %s171_s26, 1024  }
  0x4d   : > { %1683 = vsyncadd (%p2143_p13), %s171_s26, 4294966272  ;;  %p2144_p3 = scmp.eq.s32.totalorder %s1759_s16, 0 }
  0x4f   : > { %1685 = dma.done.wait (%p2144_p3), [#allocation5], 1152   ;;  %p2145_p6 = pmov %p2144_p3 }
  0x50   : > { %v1864_v0 = vld [vmem:[%s174_s20 + $0x20] sm:$0xff]  ;;  %v1866_v1 = vld [vmem:[%s174_s20 + $0x30] sm:$0xff]  ;;  %v1874_v5 = vld [vmem:[%s174_s20 + $0x28] sm:$0xff]  ;;  %s1710_s17 = smov 17   ;;  %v1711_v12 = vmov 0.0   ;;  %s1712_s18 = smov 16   ;;  %v206_v19 = vlaneseq }
  0x51   : > { %1687 = vsyncadd (%p2145_p6), [#allocation5], 4294966144  ;;  %v1868_v2 = vld [vmem:[%s174_s20] sm:$0xff]  ;;  %v1455_v3 = vpack.i.bf16 %v1866_v1, %v1864_v0  ;;  %v1872_v4 = vld [vmem:[%s174_s20 + $0x10] sm:$0xff]  ;;  %360 = vmatprep.mubr.f32.mxu0 %v1711_v12  ;;  %465 = vmatprep.mubr.f32.mxu1 %v1711_v12  ;;  %s1713_s27 = smov 15   ;;  %s1714_s21 = smov 1   ;;  %v1347_v16 = vpack.c.bf16 %v1866_v1, %v1864_v0 }
  0x52   : > { %v1876_v6 = vld [vmem:[%s174_s20 + $0x38] sm:$0xff]  ;;  %v1445_v7 = vpack.i.bf16 %v1872_v4, %v1868_v2  ;;  %v1880_v8 = vld [vmem:[%s174_s20 + $0x8] sm:$0xff]  ;;  %v1343_v14 = vpack.c.bf16 %v1872_v4, %v1868_v2  ;;  %s1715_s23 = smov 127   ;;  %s1716_s15 = smov 113   ;;  %v1719_v17 = vmov 0   ;;  %v1901_v21 = vand.u32 127, %v206_v19 }
  0x53   : > { %v1882_v9 = vld [vmem:[%s174_s20 + $0x18] sm:$0xff]  ;;  %1456 = vrot.lane.b32.xlu1 %v1455_v3, %s1710_s17  ;;  %v1460_v10 = vpack.i.bf16 %v1876_v6, %v1874_v5  ;;  %v1345_v15 = vpack.c.bf16 %v1876_v6, %v1874_v5  ;;  %s1717_s24 = smov 112   ;;  %s1718_s28 = smov 111   ;;  %1605 = vset.pattern.permute.xlu0 %v1719_v17  ;;  %v258_v18 = vld [vmem:[%s2133_s2] sm:$0x1f]  ;;  %vm292_vm3 = vcmask 261120  }
  0x54   : > { %1446 = vrot.lane.b32.xlu0 %v1445_v7, %s1710_s17  ;;  %v1450_v11 = vpack.i.bf16 %v1882_v9, %v1880_v8  ;;  %v1341_v13 = vpack.c.bf16 %v1882_v9, %v1880_v8  ;;  %vm283_vm0 = vcmp.lt.s32.totalorder %v1901_v21, 17  ;;  %vm389_vm1 = vcmp.lt.s32.totalorder %v1901_v21, 16  ;;  %p201_p7 = scmp.lt.s32.totalorder %s1759_s16, 3 }
  0x55   : > { %vm496_vm2 = vcmp.lt.s32.totalorder %v1901_v21, 15  ;;  %vm603_vm4 = vcmp.lt.s32.totalorder %v1901_v21, 1  ;;  %vm786_vm5 = vcmp.lt.s32.totalorder %v1901_v21, 127  ;;  %vm893_vm6 = vcmp.lt.s32.totalorder %v1901_v21, 113 }
  0x56   : > { %vm1000_vm7 = vcmp.lt.s32.totalorder %v1901_v21, 112  ;;  %vm1107_vm8 = vcmp.lt.s32.totalorder %v1901_v21, 111  ;;  %vm233_vm9 = vcmp.ge.s32.totalorder %v1901_v21, 16  ;;  %s2159_s16 = smov (!%p201_p7, %s1759_s16), 3 }
  0x57   : > { %1461 = vrot.lane.b32.xlu1 %v1460_v10, %s1710_s17  ;;  %s1308_s4 = sshll.u32 %s2159_s16, 4 }
  0x58   : > { %1451 = vrot.lane.b32.xlu0 %v1450_v11, %s1710_s17  ;;  %s205_s7 = scalar_lea.vmem %s2134_s3, %s1308_s4 }
  0x5b   : > { %1471 = vrot.lane.b32.xlu1 %v1450_v11, %s1712_s18 }
  0x5c   : > { %1466 = vrot.lane.b32.xlu0 %v1445_v7, %s1712_s18 }
  0x5f   : > { %1481 = vrot.lane.b32.xlu1 %v1450_v11, %s1713_s27 }
  0x60   : > { %1476 = vrot.lane.b32.xlu0 %v1445_v7, %s1713_s27 }
  0x63   : > { %1491 = vrot.lane.b32.xlu1 %v1460_v10, %s1712_s18 }
  0x64   : > { %1486 = vrot.lane.b32.xlu0 %v1455_v3, %s1712_s18 }
  0x67   : > { %1501 = vrot.lane.b32.xlu1 %v1460_v10, %s1713_s27 }
  0x68   : > { %1496 = vrot.lane.b32.xlu0 %v1455_v3, %s1713_s27 }
  0x6b   : > { %1511 = vrot.lane.b32.xlu1 %v1450_v11, %s1714_s21 }
  0x6c   : > { %1506 = vrot.lane.b32.xlu0 %v1445_v7, %s1714_s21 }
  0x6f   : > { %1521 = vrot.lane.b32.xlu1 %v1460_v10, %s1714_s21 }
  0x70   : > { %1516 = vrot.lane.b32.xlu0 %v1455_v3, %s1714_s21 }
  0x73   : > { %1531 = vrot.lane.b32.xlu1 %v1450_v11, %s1715_s23 }
  0x74   : > { %1526 = vrot.lane.b32.xlu0 %v1445_v7, %s1715_s23 }
  0x77   : > { %1541 = vrot.lane.b32.xlu1 %v1450_v11, %s1716_s15 }
  0x78   : > { %1536 = vrot.lane.b32.xlu0 %v1445_v7, %s1716_s15 }
  0x7b   : > { %1551 = vrot.lane.b32.xlu1 %v1460_v10, %s1715_s23 }
  0x7c   : > { %1546 = vrot.lane.b32.xlu0 %v1455_v3, %s1715_s23 }
  0x7f   : > { %1561 = vrot.lane.b32.xlu1 %v1460_v10, %s1716_s15 }
  0x80   : > { %1556 = vrot.lane.b32.xlu0 %v1455_v3, %s1716_s15 }
  0x83   : > { %1571 = vrot.lane.b32.xlu1 %v1450_v11, %s1717_s24 }
  0x84   : > { %1566 = vrot.lane.b32.xlu0 %v1445_v7, %s1717_s24 }
  0x87   : > { %1581 = vrot.lane.b32.xlu1 %v1450_v11, %s1718_s28  ;;  %v249_v11 = vld [vmem:[#allocation4] sm:$0x1f] }
  0x88   : > { %1576 = vrot.lane.b32.xlu0 %v1445_v7, %s1718_s28 }
  0x8b   : > { %1591 = vrot.lane.b32.xlu1 %v1460_v10, %s1717_s24 }
  0x8c   : > { %1586 = vrot.lane.b32.xlu0 %v1455_v3, %s1717_s24 }
  0x8f   : > { %1601 = vrot.lane.b32.xlu1 %v1460_v10, %s1718_s28 }
  0x90   : > { %1596 = vrot.lane.b32.xlu0 %v1455_v3, %s1718_s28 }
  0x94   : > { %1200 = vperm.xlu0 %1605, %v258_v18  }
  0xc5   : > { %v1457_v20 = vpop.permute.xlu1 %1456 }
  0xc6   : > { %v1447_v22 = vpop.permute.xlu0 %1446  ;;  %v1459_v24 = vunpack.i.h.bf16 %v1457_v20  ;;  %v1458_v25 = vunpack.i.l.bf16 %v1457_v20 }
  0xc7   : > { %v1449_v29 = vunpack.i.h.bf16 %v1447_v22  ;;  %v1448_v30 = vunpack.i.l.bf16 %v1447_v22 }
  0xc9   : > { %v1462_v23 = vpop.permute.xlu1 %1461 }
  0xca   : > { %v1464_v26 = vunpack.i.h.bf16 %v1462_v23  ;;  %v1463_v27 = vunpack.i.l.bf16 %v1462_v23  ;;  %v1452_v28 = vpop.permute.xlu0 %1451 }
  0xcb   : > { %v1454_v31 = vunpack.i.h.bf16 %v1452_v28  ;;  %v1453_v32 = vunpack.i.l.bf16 %v1452_v28 }
  0xcc   : > { %v286_v33 = vsel %vm283_vm0, %v1458_v25, %v1463_v27  ;;  %v287_v34 = vsel %vm283_vm0, %v1459_v24, %v1464_v26  ;;  %v290_v48 = vsel %vm283_vm0, %v1463_v27, %v1458_v25  ;;  %v291_v49 = vsel %vm283_vm0, %v1464_v26, %v1459_v24 }
  0xcd   : > { %v1472_v35 = vpop.permute.xlu1 %1471  ;;  %v284_v36 = vsel %vm283_vm0, %v1448_v30, %v1453_v32  ;;  %v285_v37 = vsel %vm283_vm0, %v1449_v29, %v1454_v31  ;;  %v288_v38 = vsel %vm283_vm0, %v1453_v32, %v1448_v30  ;;  %v289_v39 = vsel %vm283_vm0, %v1454_v31, %v1449_v29 }
  0xce   : > { %v1474_v40 = vunpack.i.h.bf16 %v1472_v35  ;;  %v1473_v41 = vunpack.i.l.bf16 %v1472_v35  ;;  %v1467_v42 = vpop.permute.xlu0 %1466  ;;  %v1309_v43 = vpack.c.bf16 %v285_v37, %v284_v36  ;;  %v1311_v44 = vpack.c.bf16 %v289_v39, %v288_v38 }
  0xcf   : > { %v1469_v45 = vunpack.i.h.bf16 %v1467_v42  ;;  %v1468_v46 = vunpack.i.l.bf16 %v1467_v42  ;;  %v1313_v47 = vpack.c.bf16 %v287_v34, %v286_v33  ;;  %v1315_v62 = vpack.c.bf16 %v291_v49, %v290_v48 }
  0xd0   : > { %1310 = vmatprep.subr.bf16.mxu0 %v1309_v43  ;;  %v250_v43 = vld [vmem:[#allocation4 + $0x8] sm:$0x1f] }
  0xd1   : > { %1312 = vmatpush1.bf16.msra.mxu0 %v1311_v44  ;;  %v1482_v50 = vpop.permute.xlu1 %1481  ;;  %v390_v51 = vsel %vm389_vm1, %v1468_v46, %v1473_v41  ;;  %v391_v52 = vsel %vm389_vm1, %v1469_v45, %v1474_v40  ;;  %v394_v53 = vsel %vm389_vm1, %v1473_v41, %v1468_v46  ;;  %v395_v54 = vsel %vm389_vm1, %v1474_v40, %v1469_v45 }
  0xd2   : > { %v1484_v55 = vunpack.i.h.bf16 %v1482_v50  ;;  %v1483_v56 = vunpack.i.l.bf16 %v1482_v50  ;;  %v1477_v57 = vpop.permute.xlu0 %1476  ;;  %1314 = vmatprep.subr.bf16.mxu0 %v1313_v47  ;;  %v1317_v58 = vpack.c.bf16 %v391_v52, %v390_v51  ;;  %v1319_v59 = vpack.c.bf16 %v395_v54, %v394_v53 }
  0xd3   : > { %v1479_v60 = vunpack.i.h.bf16 %v1477_v57  ;;  %v1478_v61 = vunpack.i.l.bf16 %v1477_v57 }
  0xd4   : > { %1318 = vmatprep.subr.bf16.mxu1 %v1317_v58 }
  0xd5   : > { %v502_v63 = vsel %vm496_vm2, %v1484_v55, %v1479_v60  ;;  %v501_v3 = vsel %vm496_vm2, %v1483_v56, %v1478_v61  ;;  %1316 = vmatpush1.bf16.msra.mxu0 %v1315_v62  ;;  %1320 = vmatpush1.bf16.msra.mxu1 %v1319_v59  ;;  %v1492_v7 = vpop.permute.xlu1 %1491  ;;  %v497_v10 = vsel %vm496_vm2, %v1478_v61, %v1483_v56  ;;  %v251_v56 = vld [vmem:[#allocation4 + $0x10] sm:$0x1f] }
  0xd6   : > { %v1327_v17 = vpack.c.bf16 %v502_v63, %v501_v3  ;;  %v1494_v18 = vunpack.i.h.bf16 %v1492_v7  ;;  %v1493_v19 = vunpack.i.l.bf16 %v1492_v7  ;;  %v1487_v20 = vpop.permute.xlu0 %1486  ;;  %v498_v22 = vsel %vm496_vm2, %v1479_v60, %v1484_v55 }
  0xd7   : > { %v1489_v23 = vunpack.i.h.bf16 %v1487_v20  ;;  %v1488_v24 = vunpack.i.l.bf16 %v1487_v20  ;;  %v1325_v25 = vpack.c.bf16 %v498_v22, %v497_v10 }
  0xd8   : > { %1296 = vmatmul.mubr.msk.f32.vlgmr.msra.gmra.mrb[0].mxu0 %vm292_vm3, %v249_v11 }
  0xd9   : > { %1326 = vmatprep.subr.bf16.mxu0 %v1325_v25  ;;  %v1502_v26 = vpop.permute.xlu1 %1501  ;;  %v392_v27 = vsel %vm389_vm1, %v1488_v24, %v1493_v19  ;;  %v393_v28 = vsel %vm389_vm1, %v1489_v23, %v1494_v18  ;;  %v396_v29 = vsel %vm389_vm1, %v1493_v19, %v1488_v24  ;;  %v397_v30 = vsel %vm389_vm1, %v1494_v18, %v1489_v23  ;;  %v252_v25 = vld [vmem:[#allocation4 + $0x18] sm:$0x1f] }
  0xda   : > { %1328 = vmatpush1.bf16.msra.mxu0 %v1327_v17  ;;  %v1504_v31 = vunpack.i.h.bf16 %v1502_v26  ;;  %v1503_v32 = vunpack.i.l.bf16 %v1502_v26  ;;  %v1497_v33 = vpop.permute.xlu0 %1496  ;;  %v1321_v34 = vpack.c.bf16 %v393_v28, %v392_v27  ;;  %v1323_v35 = vpack.c.bf16 %v397_v30, %v396_v29  ;;  %572 = vmatprep.mubr.f32.mxu0 %v1711_v12  ;;  %v253_v30 = vld [vmem:[#allocation4 + $0x20] sm:$0x1f] }
  0xdb   : > { %v1499_v36 = vunpack.i.h.bf16 %v1497_v33  ;;  %v1498_v37 = vunpack.i.l.bf16 %v1497_v33 }
  0xdc   : > { %1322 = vmatprep.subr.bf16.mxu1 %v1321_v34 }
  0xdd   : > { %v504_v38 = vsel %vm496_vm2, %v1504_v31, %v1499_v36  ;;  %v503_v39 = vsel %vm496_vm2, %v1503_v32, %v1498_v37  ;;  %1324 = vmatpush1.bf16.msra.mxu1 %v1323_v35  ;;  %v1512_v40 = vpop.permute.xlu1 %1511  ;;  %v499_v41 = vsel %vm496_vm2, %v1498_v37, %v1503_v32  ;;  %v500_v42 = vsel %vm496_vm2, %v1499_v36, %v1504_v31 }
  0xde   : > { %v1331_v44 = vpack.c.bf16 %v504_v38, %v503_v39  ;;  %v1514_v45 = vunpack.i.h.bf16 %v1512_v40  ;;  %v1513_v46 = vunpack.i.l.bf16 %v1512_v40  ;;  %v1507_v47 = vpop.permute.xlu0 %1506  ;;  %v1329_v48 = vpack.c.bf16 %v500_v42, %v499_v41 }
  0xdf   : > { %v1509_v49 = vunpack.i.h.bf16 %v1507_v47  ;;  %v1508_v50 = vunpack.i.l.bf16 %v1507_v47 }
  0xe0   : > { %1330 = vmatprep.subr.bf16.mxu0 %v1329_v48  ;;  %1297 = vmatmul.mubr.msk.f32.vlgmr.msra.gmra.mrb[0].mxu1 %vm292_vm3, %v250_v43 }
  0xe1   : > { %v609_v51 = vsel %vm603_vm4, %v1514_v45, %v1509_v49  ;;  %v608_v52 = vsel %vm603_vm4, %v1513_v46, %v1508_v50  ;;  %1332 = vmatpush1.bf16.msra.mxu0 %v1331_v44  ;;  %v1522_v53 = vpop.permute.xlu1 %1521  ;;  %v604_v54 = vsel %vm603_vm4, %v1508_v50, %v1513_v46  ;;  %v605_v55 = vsel %vm603_vm4, %v1509_v49, %v1514_v45 }
  0xe2   : > { %v1335_v57 = vpack.c.bf16 %v609_v51, %v608_v52  ;;  %v1524_v58 = vunpack.i.h.bf16 %v1522_v53  ;;  %v1523_v59 = vunpack.i.l.bf16 %v1522_v53  ;;  %v1517_v60 = vpop.permute.xlu0 %1516  ;;  %v1333_v61 = vpack.c.bf16 %v605_v55, %v604_v54  ;;  %1342 = vmatprep.subr.bf16.mxu0 %v1341_v13  ;;  %679 = vmatprep.mubr.f32.mxu1 %v1711_v12  ;;  %v254_v55 = vld [vmem:[#allocation4 + $0x28] sm:$0x1f] }
  0xe3   : > { %v1519_v62 = vunpack.i.h.bf16 %v1517_v60  ;;  %v1518_v63 = vunpack.i.l.bf16 %v1517_v60 }
  0xe4   : > { %1334 = vmatprep.subr.bf16.mxu1 %v1333_v61  ;;  %1298 = vmatmul.mubr.msk.f32.vlgmr.msra.gmra.mrb[2].mxu0 %vm292_vm3, %v251_v56 }
  0xe5   : > { %v611_v3 = vsel %vm603_vm4, %v1524_v58, %v1519_v62  ;;  %v610_v7 = vsel %vm603_vm4, %v1523_v59, %v1518_v63  ;;  %1336 = vmatpush1.bf16.msra.mxu1 %v1335_v57  ;;  %v1532_v10 = vpop.permute.xlu1 %1531  ;;  %v606_v8 = vsel %vm603_vm4, %v1518_v63, %v1523_v59  ;;  %v607_v9 = vsel %vm603_vm4, %v1519_v62, %v1524_v58 }
  0xe6   : > { %v1339_v13 = vpack.c.bf16 %v611_v3, %v610_v7  ;;  %v1534_v11 = vunpack.i.h.bf16 %v1532_v10  ;;  %v1533_v17 = vunpack.i.l.bf16 %v1532_v10  ;;  %v1527_v18 = vpop.permute.xlu0 %1526  ;;  %v1337_v19 = vpack.c.bf16 %v607_v9, %v606_v8  ;;  %1344 = vmatpush1.bf16.msra.mxu0 %v1343_v14  ;;  %761 = vmatprep.mubr.f32.mxu0 %v1711_v12  ;;  %v255_v9 = vld [vmem:[#allocation4 + $0x30] sm:$0x1f] }
  0xe7   : > { %v1529_v20 = vunpack.i.h.bf16 %v1527_v18  ;;  %v1528_v22 = vunpack.i.l.bf16 %v1527_v18  ;;  %1346 = vmatprep.subr.bf16.mxu0 %v1345_v15 }
  0xe8   : > { %1338 = vmatprep.subr.bf16.mxu1 %v1337_v19 }
  0xe9   : > { %v788_v23 = vsel %vm786_vm5, %v1529_v20, %v1534_v11  ;;  %v787_v24 = vsel %vm786_vm5, %v1528_v22, %v1533_v17  ;;  %1340 = vmatpush1.bf16.msra.mxu1 %v1339_v13  ;;  %v1542_v2 = vpop.permute.xlu1 %1541  ;;  %v791_v4 = vsel %vm786_vm5, %v1533_v17, %v1528_v22  ;;  %v792_v14 = vsel %vm786_vm5, %v1534_v11, %v1529_v20 }
  0xea   : > { %v1351_v5 = vpack.c.bf16 %v788_v23, %v787_v24  ;;  %v1544_v6 = vunpack.i.h.bf16 %v1542_v2  ;;  %v1543_v15 = vunpack.i.l.bf16 %v1542_v2  ;;  %v1537_v26 = vpop.permute.xlu0 %1536  ;;  %v1349_v27 = vpack.c.bf16 %v792_v14, %v791_v4  ;;  %1348 = vmatpush1.bf16.msra.mxu0 %v1347_v16 }
  0xeb   : > { %v1539_v28 = vunpack.i.h.bf16 %v1537_v26  ;;  %v1538_v29 = vunpack.i.l.bf16 %v1537_v26 }
  0xec   : > { %1350 = vmatprep.subr.bf16.mxu1 %v1349_v27  ;;  %1299 = vmatmul.mubr.msk.f32.vlgmr.msra.gmra.mrb[2].mxu1 %vm292_vm3, %v252_v25 }
  0xed   : > { %v895_v31 = vsel %vm893_vm6, %v1539_v28, %v1544_v6  ;;  %v894_v32 = vsel %vm893_vm6, %v1538_v29, %v1543_v15  ;;  %1352 = vmatpush1.bf16.msra.mxu1 %v1351_v5  ;;  %v1552_v33 = vpop.permute.xlu1 %1551  ;;  %v898_v34 = vsel %vm893_vm6, %v1543_v15, %v1538_v29  ;;  %v899_v0 = vsel %vm893_vm6, %v1544_v6, %v1539_v28 }
  0xee   : > { %v1359_v1 = vpack.c.bf16 %v895_v31, %v894_v32  ;;  %v1554_v16 = vunpack.i.h.bf16 %v1552_v33  ;;  %v1553_v35 = vunpack.i.l.bf16 %v1552_v33  ;;  %v1547_v36 = vpop.permute.xlu0 %1546  ;;  %v1357_v37 = vpack.c.bf16 %v899_v0, %v898_v34  ;;  %1300 = vmatmul.mubr.msk.f32.vlgmr.msra.gmra.mrb[4].mxu0 %vm292_vm3, %v253_v30  ;;  %862 = vmatprep.mubr.f32.mxu1 %v1711_v12 }
  0xef   : > { %v1549_v38 = vunpack.i.h.bf16 %v1547_v36  ;;  %v1548_v39 = vunpack.i.l.bf16 %v1547_v36  ;;  %969 = vmatprep.mubr.f32.mxu0 %v1711_v12 }
  0xf0   : > { %1358 = vmatprep.subr.bf16.mxu0 %v1357_v37 }
  0xf1   : > { %v790_v40 = vsel %vm786_vm5, %v1549_v38, %v1554_v16  ;;  %v789_v41 = vsel %vm786_vm5, %v1548_v39, %v1553_v35  ;;  %1360 = vmatpush1.bf16.msra.mxu0 %v1359_v1  ;;  %v1562_v42 = vpop.permute.xlu1 %1561  ;;  %v793_v43 = vsel %vm786_vm5, %v1553_v35, %v1548_v39  ;;  %v794_v44 = vsel %vm786_vm5, %v1554_v16, %v1549_v38 }
  0xf2   : > { %v1355_v45 = vpack.c.bf16 %v790_v40, %v789_v41  ;;  %v1564_v46 = vunpack.i.h.bf16 %v1562_v42  ;;  %v1563_v47 = vunpack.i.l.bf16 %v1562_v42  ;;  %v1557_v48 = vpop.permute.xlu0 %1556  ;;  %v1353_v49 = vpack.c.bf16 %v794_v44, %v793_v43  ;;  %v256_v41 = vld [vmem:[#allocation4 + $0x38] sm:$0x1f] }
  0xf3   : > { %v1559_v50 = vunpack.i.h.bf16 %v1557_v48  ;;  %v1558_v51 = vunpack.i.l.bf16 %v1557_v48  ;;  %v213_v48 = vand.u32 15, %v1901_v21 }
  0xf4   : > { %1354 = vmatprep.subr.bf16.mxu1 %v1353_v49 }
  0xf5   : > { %v897_v52 = vsel %vm893_vm6, %v1559_v50, %v1564_v46  ;;  %v896_v53 = vsel %vm893_vm6, %v1558_v51, %v1563_v47  ;;  %1356 = vmatpush1.bf16.msra.mxu1 %v1355_v45  ;;  %v1572_v54 = vpop.permute.xlu1 %1571  ;;  %v900_v56 = vsel %vm893_vm6, %v1563_v47, %v1558_v51  ;;  %v901_v57 = vsel %vm893_vm6, %v1564_v46, %v1559_v50  ;;  %v257_v46 = vld [vmem:[#allocation4 + $0x40] sm:$0x1f] }
  0xf6   : > { %v1363_v58 = vpack.c.bf16 %v897_v52, %v896_v53  ;;  %v1574_v59 = vunpack.i.h.bf16 %v1572_v54  ;;  %v1573_v60 = vunpack.i.l.bf16 %v1572_v54  ;;  %v1567_v61 = vpop.permute.xlu0 %1566  ;;  %v1361_v62 = vpack.c.bf16 %v901_v57, %v900_v56 }
  0xf7   : > { %v1569_v63 = vunpack.i.h.bf16 %v1567_v61  ;;  %v1568_v3 = vunpack.i.l.bf16 %v1567_v61  ;;  %v208_v47 = vadd.s32 128, %v1901_v21  ;;  %vm2070_vm10 = vcmp.ge.s32.totalorder %v213_v48, 1 }
  0xf8   : > { %1301 = vmatmul.mubr.msk.f32.vlgmr.msra.gmra.mrb[4].mxu1 %vm292_vm3, %v254_v55  ;;  %1362 = vmatprep.subr.bf16.mxu0 %v1361_v62  ;;  %vm237_vm11 = vmand %vm233_vm9, %vm2070_vm10  ;;  %vm2082_vm13 = vcmp.le.s32.totalorder %v213_v48, 14 }
  0xf9   : > { %v1002_v7 = vsel %vm1000_vm7, %v1569_v63, %v1574_v59  ;;  %v1001_v10 = vsel %vm1000_vm7, %v1568_v3, %v1573_v60  ;;  %1364 = vmatpush1.bf16.msra.mxu0 %v1363_v58  ;;  %v1582_v8 = vpop.permute.xlu1 %1581  ;;  %v1005_v13 = vsel %vm1000_vm7, %v1573_v60, %v1568_v3  ;;  %v1006_v11 = vsel %vm1000_vm7, %v1574_v59, %v1569_v63  ;;  %vm241_vm14 = vmand %vm233_vm9, %vm2082_vm13 }
  0xfa   : > { %v1367_v17 = vpack.c.bf16 %v1002_v7, %v1001_v10  ;;  %v1584_v18 = vunpack.i.h.bf16 %v1582_v8  ;;  %v1583_v19 = vunpack.i.l.bf16 %v1582_v8  ;;  %v1577_v20 = vpop.permute.xlu0 %1576  ;;  %v1365_v22 = vpack.c.bf16 %v1006_v11, %v1005_v13  ;;  %1076 = vmatprep.mubr.f32.mxu1 %v1711_v12 }
  0xfb   : > { %v1579_v23 = vunpack.i.h.bf16 %v1577_v20  ;;  %v1578_v24 = vunpack.i.l.bf16 %v1577_v20  ;;  %v220_v50 = vand.u32 15, %v208_v47  ;;  %vm244_vm0 = vcmp.lt.s32.totalorder %v208_v47, 240 }
  0xfc   : > { %1302 = vmatmul.mubr.msk.f32.vlgmr.msra.gmra.mrb[6].mxu0 %vm292_vm3, %v255_v9  ;;  %1366 = vmatprep.subr.bf16.mxu1 %v1365_v22 }
  0xfd   : > { %v1109_v2 = vsel %vm1107_vm8, %v1579_v23, %v1584_v18  ;;  %v1108_v4 = vsel %vm1107_vm8, %v1578_v24, %v1583_v19  ;;  %1368 = vmatpush1.bf16.msra.mxu1 %v1367_v17  ;;  %v1592_v14 = vpop.permute.xlu1 %1591  ;;  %v1112_v25 = vsel %vm1107_vm8, %v1583_v19, %v1578_v24  ;;  %v1113_v5 = vsel %vm1107_vm8, %v1584_v18, %v1579_v23 }
  0xfe   : > { %v1375_v6 = vpack.c.bf16 %v1109_v2, %v1108_v4  ;;  %v1594_v15 = vunpack.i.h.bf16 %v1592_v14  ;;  %v1593_v26 = vunpack.i.l.bf16 %v1592_v14  ;;  %v1587_v27 = vpop.permute.xlu0 %1586  ;;  %v1373_v28 = vpack.c.bf16 %v1113_v5, %v1112_v25  ;;  %1183 = vmatprep.mubr.f32.mxu0 %v1711_v12 }
  0xff   : > { %v1589_v29 = vunpack.i.h.bf16 %v1587_v27  ;;  %v1588_v30 = vunpack.i.l.bf16 %v1587_v27  ;;  %vm2076_vm12 = vcmp.ge.s32.totalorder %v220_v50, 1  ;;  %vm2088_vm15 = vcmp.le.s32.totalorder %v220_v50, 14 }
 0x100   : > { %1374 = vmatprep.subr.bf16.mxu0 %v1373_v28  ;;  %vm246_vm1 = vmand %vm244_vm0, %vm2076_vm12 }
 0x101   : > { %v1004_v31 = vsel %vm1000_vm7, %v1589_v29, %v1594_v15  ;;  %v1003_v32 = vsel %vm1000_vm7, %v1588_v30, %v1593_v26  ;;  %1376 = vmatpush1.bf16.msra.mxu0 %v1375_v6  ;;  %v1602_v33 = vpop.permute.xlu1 %1601  ;;  %v1007_v34 = vsel %vm1000_vm7, %v1593_v26, %v1588_v30  ;;  %v1008_v0 = vsel %vm1000_vm7, %v1594_v15, %v1589_v29  ;;  %vm248_vm2 = vmand %vm244_vm0, %vm2088_vm15 }
 0x102   : > { %v1371_v1 = vpack.c.bf16 %v1004_v31, %v1003_v32  ;;  %v1604_v16 = vunpack.i.h.bf16 %v1602_v33  ;;  %v1603_v12 = vunpack.i.l.bf16 %v1602_v33  ;;  %v1597_v35 = vpop.permute.xlu0 %1596  ;;  %v1369_v36 = vpack.c.bf16 %v1008_v0, %v1007_v34 }
 0x103   : > { %v1599_v37 = vunpack.i.h.bf16 %v1597_v35  ;;  %v1598_v38 = vunpack.i.l.bf16 %v1597_v35 }
 0x104   : > { %1370 = vmatprep.subr.bf16.mxu1 %v1369_v36 }
 0x105   : > { %v1111_v39 = vsel %vm1107_vm8, %v1599_v37, %v1604_v16  ;;  %v1110_v40 = vsel %vm1107_vm8, %v1598_v38, %v1603_v12  ;;  %1372 = vmatpush1.bf16.msra.mxu1 %v1371_v1  ;;  %v1114_v42 = vsel %vm1107_vm8, %v1603_v12, %v1598_v38  ;;  %v1115_v43 = vsel %vm1107_vm8, %v1604_v16, %v1599_v37 }
 0x106   : > { %v1379_v44 = vpack.c.bf16 %v1111_v39, %v1110_v40  ;;  %v1377_v45 = vpack.c.bf16 %v1115_v43, %v1114_v42 }
 0x108   : > { %1303 = vmatmul.mubr.msk.f32.vlgmr.msra.gmra.mrb[6].mxu1 %vm292_vm3, %v256_v41  ;;  %1378 = vmatprep.subr.bf16.mxu0 %v1377_v45 }
 0x109   : > { %1380 = vmatpush1.bf16.msra.mxu0 %v1379_v44 }
 0x10c   : > { %1304 = vmatmul.mubr.msk.f32.vlgmr.msra.gmra.mrb[8].mxu0 %vm292_vm3, %v257_v46 }
 0x113   : > { %v1201_v35 = vpop.permute.xlu0 %1200 }
 0x1ab   : > { %v362_v49 = vpop.f32.mrb[0].mxu0 }
 0x1ac   : > { %v364_v52 = vpop.f32.mrb[1].mxu0  ;;  %v371_v54 = vsel %vm237_vm11, %v362_v49, 0.0 }
 0x1ad   : > { %v372_v55 = vsel %vm2076_vm12, %v364_v52, 0.0 }
 0x1b3   : > { %v467_v21 = vpop.f32.mrb[0].mxu1 }
 0x1b4   : > { %v476_v57 = vsel %vm233_vm9, %v467_v21, 0.0  ;;  %v469_v58 = vpop.f32.mrb[1].mxu1 }
 0x1b5   : > { %v478_v59 = vadd.f32 %v476_v57, %v371_v54  ;;  %v479_v60 = vadd.f32 %v469_v58, %v372_v55 }
 0x1b7   : > { %v574_v62 = vpop.f32.mrb[2].mxu0 }
 0x1b8   : > { %v583_v63 = vsel %vm241_vm14, %v574_v62, 0.0  ;;  %v576_v3 = vpop.f32.mrb[3].mxu0 }
 0x1b9   : > { %v585_v7 = vadd.f32 %v583_v63, %v478_v59  ;;  %v584_v10 = vsel %vm2088_vm15, %v576_v3, 0.0 }
 0x1ba   : > { %v586_v8 = vadd.f32 %v584_v10, %v479_v60 }
 0x1bf   : > { %v681_v9 = vpop.f32.mrb[2].mxu1 }
 0x1c0   : > { %v690_v13 = vsel %vm2070_vm10, %v681_v9, 0.0  ;;  %v683_v11 = vpop.f32.mrb[3].mxu1 }
 0x1c1   : > { %v692_v17 = vadd.f32 %v690_v13, %v585_v7  ;;  %v691_v18 = vsel %vm2076_vm12, %v683_v11, 0.0  ;;  %v763_v19 = vpop.f32.mrb[4].mxu0 }
 0x1c2   : > { %v693_v20 = vadd.f32 %v691_v18, %v586_v8  ;;  %v765_v22 = vpop.f32.mrb[5].mxu0 }
 0x1c3   : > { %v768_v23 = vadd.f32 %v763_v19, %v692_v17 }
 0x1c4   : > { %v769_v24 = vadd.f32 %v765_v22, %v693_v20 }
 0x1cb   : > { %v864_v2 = vpop.f32.mrb[4].mxu1 }
 0x1cc   : > { %v873_v4 = vsel %vm2082_vm13, %v864_v2, 0.0  ;;  %v866_v14 = vpop.f32.mrb[5].mxu1 }
 0x1cd   : > { %v875_v25 = vadd.f32 %v873_v4, %v768_v23  ;;  %v874_v5 = vsel %vm2088_vm15, %v866_v14, 0.0 }
 0x1ce   : > { %v876_v6 = vadd.f32 %v874_v5, %v769_v24 }
 0x1cf   : > { %v971_v15 = vpop.f32.mrb[6].mxu0 }
 0x1d0   : > { %v980_v26 = vsel %vm2070_vm10, %v971_v15, 0.0  ;;  %v973_v27 = vpop.f32.mrb[7].mxu0 }
 0x1d1   : > { %v982_v28 = vadd.f32 %v980_v26, %v875_v25  ;;  %v981_v29 = vsel %vm246_vm1, %v973_v27, 0.0 }
 0x1d2   : > { %v983_v30 = vadd.f32 %v981_v29, %v876_v6 }
 0x1db   : > { %v1078_v31 = vpop.f32.mrb[6].mxu1 }
 0x1dc   : > { %v1089_v32 = vadd.f32 %v1078_v31, %v982_v28  ;;  %v1080_v33 = vpop.f32.mrb[7].mxu1 }
 0x1dd   : > { %v1088_v34 = vsel %vm244_vm0, %v1080_v33, 0.0 }
 0x1de   : > { %v1090_v0 = vadd.f32 %v1088_v34, %v983_v30 }
 0x1df   : > { %v1185_v1 = vpop.f32.mrb[8].mxu0 }
 0x1e0   : > { %v1194_v16 = vsel %vm2082_vm13, %v1185_v1, 0.0  ;;  %v1187_v12 = vpop.f32.mrb[9].mxu0 }
 0x1e1   : > { %v1196_v36 = vadd.f32 %v1194_v16, %v1089_v32  ;;  %v1195_v37 = vsel %vm248_vm2, %v1187_v12, 0.0 }
 0x1e2   : > { %v1197_v38 = vadd.f32 %v1195_v37, %v1090_v0 }
 0x1e3   : > { %v1203_v39 = vadd.f32 %v1201_v35, %v1196_v36 }
 0x1e4   : > { %v1204_v40 = vadd.f32 %v1201_v35, %v1197_v38 }
 0x1e5   : > { %1205 = vst [vmem:[%s205_s7] sm:$0x1f] %v1203_v39 }
 0x1e6   : > { %1206 = vst [vmem:[%s205_s7 + $0x8] sm:$0x1f] %v1204_v40 }
 0x1e7 PF: > { %p14_p8 = scmp.ge.s32.totalorder %s1784_s22, 6   ;;  %s2154_s12 = smov %s1694_s13 }
 0x1e8   : > { %s2155_s13 = smov %s1698_s14  ;;  %s2156_s14 = smov %s1810_s10 }
 0x1e9   : > { %s2157_s15 = smov %s1784_s22  ;;  %16 = sbr.rel (!%p14_p8) target bundleno = 4 (0x4), region = 76 }
 0x1f0   :  { %1228 = vsyncpa [#allocation3], 1 }
 0x1f1   :  { %1230 = vsyncpa [#allocation3 + $0x1], 1 }
 0x1f2   :  { %1231 = vsyncpa [#allocation5], 1 }

</bundles_post_ra>
